<compile_context>
chip_gen: v6e
topology: v6e:2x2x1
jax: 0.10.0
libtpu: 0.0.40
codegen_flags: <defaults>
</compile_context>

<pallas_src>
import jax
import jax.numpy as jnp
import numpy as np
from jax.experimental import pallas as pl
from jax.experimental.pallas import tpu as pltpu


def hafm_kernel(x_ref, w1_ref, b1_ref, w2_ref, b2_ref, out_ref):
    # x_ref: (C, TN) tile -- channels on sublanes, pixels on the lane axis.
    x = x_ref[...]                                                   # (C, TN) f32

    # conv1 (1x1) -> ReLU :  h = W1 @ x + b1
    h = jnp.dot(w1_ref[...], x, preferred_element_type=jnp.float32) + b1_ref[...]
    h = jnp.maximum(h, 0.0)

    # conv2 (1x1) :  t = W2 @ h + b2
    t = jnp.dot(w2_ref[...], h, preferred_element_type=jnp.float32) + b2_ref[...]

    # softmax over the channel (sublane) axis
    t = t - jnp.max(t, axis=0, keepdims=True)
    e = jnp.exp(t)
    denom = jnp.sum(e, axis=0, keepdims=True)                        # (1, TN)
    attn = e * pl.reciprocal(denom, approx=True)                     # EUP vrcp

    # weighted channel sum -> lane-dense (1, TN) output row
    out_ref[...] = jnp.sum(attn * x, axis=0, keepdims=True).astype(out_ref.dtype)


def _choose_tile(HW, C, tn_req):
    """Pick the pixel tile TN and the (possibly padded) spatial extent."""
    # VMEM budget: ~8 live f32 (C, tn)-sized buffers (double-buffered x tile
    # + intermediates); keep well under v7x's 64 MiB per-TC VMEM.
    budget = 12 * 1024 * 1024
    per_col = 8 * max(C, 8) * 4
    tn_cap = max(128, (budget // per_col) // 128 * 128)
    if HW <= tn_cap:
        return HW, HW                       # full spatial extent, no padding
    tn = min(max(128, (tn_req // 128) * 128), tn_cap)
    return tn, pl.cdiv(HW, tn) * tn


def hafm_forward(x_nchw, w1_oi, b1, w2_oi, b2, *, tn_req=4096):
    """x_nchw: (B, C, H, W) float32.  w*_oi: (C_out, C_in) 1x1-conv weights."""
    B, C, H, W = x_nchw.shape
    HW = H * W

    # (B, C, H*W) is a free view of NCHW: no wrapper transpose / copy.
    x3 = x_nchw.reshape(B, C, HW).astype(jnp.float32)

    tn, hw_pad = _choose_tile(HW, C, tn_req)
    if hw_pad != HW:
        # Padded pixel columns produce harmless values and are sliced off below.
        x3 = jnp.pad(x3, ((0, 0), (0, 0), (0, hw_pad - HW)))

    w1_m = w1_oi.astype(jnp.float32)          # (C_out, C_in): t = W @ x
    w2_m = w2_oi.astype(jnp.float32)
    b1_col = b1.reshape(C, 1).astype(jnp.float32)
    b2_col = b2.reshape(C, 1).astype(jnp.float32)

    # Advisory cost so XLA can overlap neighbouring ops with the kernel.
    N = B * HW
    cost = pl.CostEstimate(
        flops=int(4 * N * C * C + 8 * N * C),
        transcendentals=int(N * C + N),
        bytes_accessed=int(4 * (N * C + N + 2 * C * C + 2 * C)),
    )

    # Per-step VMEM: double-buffered x/out tiles + resident params + ~6 live
    # (C, tn) intermediates, with 2x headroom; clamped under 48 MiB.
    vmem_est = 4 * (2 * C * tn + 2 * tn + 6 * C * tn + 2 * C * C + 2 * C)
    vmem_limit = int(min(48 * 1024 * 1024, max(8 * 1024 * 1024, 2 * vmem_est)))

    out = pl.pallas_call(
        hafm_kernel,
        out_shape=jax.ShapeDtypeStruct((B, 1, hw_pad), jnp.float32),
        grid=(B, hw_pad // tn),
        in_specs=[
            pl.BlockSpec((None, C, tn), lambda b, j: (b, 0, j)),  # x tile (lane-dense)
            pl.BlockSpec((C, C), lambda b, j: (0, 0)),            # w1 (resident)
            pl.BlockSpec((C, 1), lambda b, j: (0, 0)),            # b1
            pl.BlockSpec((C, C), lambda b, j: (0, 0)),            # w2
            pl.BlockSpec((C, 1), lambda b, j: (0, 0)),            # b2
        ],
        out_specs=pl.BlockSpec((None, 1, tn), lambda b, j: (b, 0, j)),
        compiler_params=pltpu.CompilerParams(
            dimension_semantics=("parallel", "parallel"),
            vmem_limit_bytes=vmem_limit,
        ),
        cost_estimate=cost,
    )(x3, w1_m, b1_col, w2_m, b2_col)

    # (B, 1, HW) -> (B, 1, H, W); drop any padded pixel columns.
    return out[:, :, :HW].reshape(B, 1, H, W)


def hafm_reference(x_nchw, w1_oi, b1, w2_oi, b2):
    """Pure-JAX reference mimicking the PyTorch forward (NCHW)."""
    h = jnp.einsum("oc,bchw->bohw", w1_oi, x_nchw) + b1[None, :, None, None]
    h = jnp.maximum(h, 0.0)
    t = jnp.einsum("oc,bchw->bohw", w2_oi, h) + b2[None, :, None, None]
    a = jax.nn.softmax(t, axis=1)
    return jnp.sum(a * x_nchw, axis=1, keepdims=True)


if __name__ == "__main__":
    B, C, H, W = 2, 4, 16, 16

    key = jax.random.PRNGKey(0)
    kx, kw1, kb1, kw2, kb2 = jax.random.split(key, 5)

    x = jax.random.normal(kx, (B, C, H, W), dtype=jnp.float32)
    # Deterministic synthetic parameters (conv-style (out, in) shapes; k=1x1).
    w1 = jax.random.normal(kw1, (C, C), dtype=jnp.float32) * 0.5
    b1 = jax.random.normal(kb1, (C,), dtype=jnp.float32) * 0.1
    w2 = jax.random.normal(kw2, (C, C), dtype=jnp.float32) * 0.5
    b2 = jax.random.normal(kb2, (C,), dtype=jnp.float32) * 0.1

    y = hafm_forward(x, w1, b1, w2, b2)
    y = jax.block_until_ready(y)

    y_ref = jax.block_until_ready(hafm_reference(x, w1, b1, w2, b2))
    assert y.shape == (B, 1, H, W)
    # Tolerance is relaxed slightly (vs 1e-5) because the softmax denominator
    # uses the EUP approximate reciprocal; outputs are O(1), so 5e-3 still
    # catches any layout/semantics error by >100x margin.
    np.testing.assert_allclose(np.asarray(y), np.asarray(y_ref),
                               rtol=5e-3, atol=5e-3)
    print("KERNEL_OK")
</pallas_src>

<mosaic_0001>
module attributes {stable_mosaic.version = 11 : i64} {
  func.func @hafm_kernel(%arg0: i32, %arg1: i32, %arg2: memref<1x4x256xf32, #tpu.memory_space<vmem>>, %arg3: memref<4x4xf32, #tpu.memory_space<vmem>>, %arg4: memref<4x1xf32, #tpu.memory_space<vmem>>, %arg5: memref<4x4xf32, #tpu.memory_space<vmem>>, %arg6: memref<4x1xf32, #tpu.memory_space<vmem>>, %arg7: memref<1x1x256xf32, #tpu.memory_space<vmem>>) attributes {dimension_semantics = [#tpu.dimension_semantics<parallel>, #tpu.dimension_semantics<parallel>], iteration_bounds = array<i64: 2, 1>, scalar_prefetch = 0 : i64, scratch_operands = 0 : i64, tpu.core_type = #tpu.core_type<tc>, window_params = [{transform_indices = @transform_0, window_bounds = array<i64: 1, 4, 256>}, {pipeline_mode = #tpu.pipeline_mode<synchronous>, transform_indices = @transform_1, window_bounds = array<i64: 4, 4>}, {pipeline_mode = #tpu.pipeline_mode<synchronous>, transform_indices = @transform_2, window_bounds = array<i64: 4, 1>}, {pipeline_mode = #tpu.pipeline_mode<synchronous>, transform_indices = @transform_3, window_bounds = array<i64: 4, 4>}, {pipeline_mode = #tpu.pipeline_mode<synchronous>, transform_indices = @transform_4, window_bounds = array<i64: 4, 1>}, {transform_indices = @transform_5, window_bounds = array<i64: 1, 1, 256>}]} {
    %c0 = arith.constant 0 : index
    %c0_0 = arith.constant 0 : index
    %c0_1 = arith.constant 0 : index
    %0 = vector.load %arg2[%c0, %c0_0, %c0_1] : memref<1x4x256xf32, #tpu.memory_space<vmem>>, vector<1x4x256xf32>
    %1 = vector.shape_cast %0 : vector<1x4x256xf32> to vector<4x256xf32>
    %c0_2 = arith.constant 0 : index
    %c0_3 = arith.constant 0 : index
    %2 = vector.load %arg3[%c0_2, %c0_3] : memref<4x4xf32, #tpu.memory_space<vmem>>, vector<4x4xf32>
    %cst = arith.constant dense<0.000000e+00> : vector<4x256xf32>
    %3 = tpu.matmul %2, %1, %cst {dimension_numbers = #tpu.dot_dimension_numbers<[1], [0], [0], [1], [0, 0, 1, 1], [], []>} : vector<4x4xf32>, vector<4x256xf32>, vector<4x256xf32> -> vector<4x256xf32>
    %c0_4 = arith.constant 0 : index
    %c0_5 = arith.constant 0 : index
    %4 = vector.load %arg4[%c0_4, %c0_5] : memref<4x1xf32, #tpu.memory_space<vmem>>, vector<4x1xf32>
    %5 = vector.broadcast %4 : vector<4x1xf32> to vector<4x256xf32>
    %6 = arith.addf %3, %5 : vector<4x256xf32>
    %cst_6 = arith.constant 0.000000e+00 : f32
    %7 = vector.broadcast %cst_6 : f32 to vector<4x256xf32>
    %8 = arith.maximumf %6, %7 : vector<4x256xf32>
    %c0_7 = arith.constant 0 : index
    %c0_8 = arith.constant 0 : index
    %9 = vector.load %arg5[%c0_7, %c0_8] : memref<4x4xf32, #tpu.memory_space<vmem>>, vector<4x4xf32>
    %cst_9 = arith.constant dense<0.000000e+00> : vector<4x256xf32>
    %10 = tpu.matmul %9, %8, %cst_9 {dimension_numbers = #tpu.dot_dimension_numbers<[1], [0], [0], [1], [0, 0, 1, 1], [], []>} : vector<4x4xf32>, vector<4x256xf32>, vector<4x256xf32> -> vector<4x256xf32>
    %c0_10 = arith.constant 0 : index
    %c0_11 = arith.constant 0 : index
    %11 = vector.load %arg6[%c0_10, %c0_11] : memref<4x1xf32, #tpu.memory_space<vmem>>, vector<4x1xf32>
    %12 = vector.broadcast %11 : vector<4x1xf32> to vector<4x256xf32>
    %13 = arith.addf %10, %12 : vector<4x256xf32>
    %cst_12 = arith.constant dense<0xFF800000> : vector<256xf32>
    %14 = vector.multi_reduction <maximumf>, %13, %cst_12 [0] : vector<4x256xf32> to vector<256xf32>
    %15 = vector.shape_cast %14 : vector<256xf32> to vector<1x256xf32>
    %16 = vector.broadcast %15 : vector<1x256xf32> to vector<4x256xf32>
    %17 = arith.subf %13, %16 : vector<4x256xf32>
    %18 = math.exp %17 : vector<4x256xf32>
    %cst_13 = arith.constant dense<0.000000e+00> : vector<256xf32>
    %19 = vector.multi_reduction <add>, %18, %cst_13 [0] : vector<4x256xf32> to vector<256xf32>
    %20 = vector.shape_cast %19 : vector<256xf32> to vector<1x256xf32>
    %21 = tpu.reciprocal %20 {approx = true} : vector<1x256xf32> -> vector<1x256xf32>
    %22 = vector.broadcast %21 : vector<1x256xf32> to vector<4x256xf32>
    %23 = arith.mulf %18, %22 : vector<4x256xf32>
    %24 = arith.mulf %23, %1 : vector<4x256xf32>
    %cst_14 = arith.constant dense<0.000000e+00> : vector<256xf32>
    %25 = vector.multi_reduction <add>, %24, %cst_14 [0] : vector<4x256xf32> to vector<256xf32>
    %26 = vector.shape_cast %25 : vector<256xf32> to vector<1x256xf32>
    %c0_15 = arith.constant 0 : index
    %c0_16 = arith.constant 0 : index
    %c0_17 = arith.constant 0 : index
    %27 = vector.load %arg7[%c0_15, %c0_16, %c0_17] : memref<1x1x256xf32, #tpu.memory_space<vmem>>, vector<1x1x256xf32>
    %28 = vector.shape_cast %27 : vector<1x1x256xf32> to vector<1x256xf32>
    %29 = vector.shape_cast %26 : vector<1x256xf32> to vector<1x1x256xf32>
    tpu.vector_store %arg7[%c0_15, %c0_16, %c0_17], %29 {strides = array<i32>} : memref<1x1x256xf32, #tpu.memory_space<vmem>>, vector<1x1x256xf32>,
    return
  }
  func.func @transform_0(%arg0: i32, %arg1: i32) -> (i32, i32, i32) {
    %c0_i32 = arith.constant 0 : i32
    %c0_i32_0 = arith.constant 0 : i32
    return %arg0, %c0_i32, %arg1 : i32, i32, i32
  }
  func.func @transform_1(%arg0: i32, %arg1: i32) -> (i32, i32) {
    %c0_i32 = arith.constant 0 : i32
    %c0_i32_0 = arith.constant 0 : i32
    %c0_i32_1 = arith.constant 0 : i32
    return %c0_i32, %c0_i32_0 : i32, i32
  }
  func.func @transform_2(%arg0: i32, %arg1: i32) -> (i32, i32) {
    %c0_i32 = arith.constant 0 : i32
    %c0_i32_0 = arith.constant 0 : i32
    %c0_i32_1 = arith.constant 0 : i32
    return %c0_i32, %c0_i32_0 : i32, i32
  }
  func.func @transform_3(%arg0: i32, %arg1: i32) -> (i32, i32) {
    %c0_i32 = arith.constant 0 : i32
    %c0_i32_0 = arith.constant 0 : i32
    %c0_i32_1 = arith.constant 0 : i32
    return %c0_i32, %c0_i32_0 : i32, i32
  }
  func.func @transform_4(%arg0: i32, %arg1: i32) -> (i32, i32) {
    %c0_i32 = arith.constant 0 : i32
    %c0_i32_0 = arith.constant 0 : i32
    %c0_i32_1 = arith.constant 0 : i32
    return %c0_i32, %c0_i32_0 : i32, i32
  }
  func.func @transform_5(%arg0: i32, %arg1: i32) -> (i32, i32, i32) {
    %c0_i32 = arith.constant 0 : i32
    %c0_i32_0 = arith.constant 0 : i32
    return %arg0, %c0_i32, %arg1 : i32, i32, i32
  }
}

</mosaic_0001>

<bundles_post_ra>
// kernel: tpu_custom_call.1
= control target key start
LH: loop header
LB: loop body
LE: loop exit
PB: predicated region body
PF: predicated region fallthrough
CT: control target
= control target key end

     0   :  { %10 = vsyncpa [#allocation3], 0  ;;  %s1031_s0 = inlined_call_operand.hbm [shape: f32[2,4,256], index: 0, kind: input, shape index: {}]   ;;  %s1032_s1 = inlined_call_operand.vmem [shape: f32[4,4], index: 1, kind: input, shape index: {}]   ;;  %s1033_s2 = inlined_call_operand.vmem [shape: f32[4,1], index: 2, kind: input, shape index: {}]   ;;  %s1034_s3 = inlined_call_operand.vmem [shape: f32[4,4], index: 3, kind: input, shape index: {}]   ;;  %s1035_s4 = inlined_call_operand.vmem [shape: f32[4,1], index: 4, kind: input, shape index: {}]   ;;  %s1036_s5 = inlined_call_operand.hbm [shape: f32[2,1,256], index: 5, kind: output, shape index: {}]  }
   0x1   :  { %12 = vsyncpa [#allocation3 + $0x1], 0 }
   0x2   :  { %13 = vsyncpa [#allocation4], 0 }
   0x3   :  { %15 = vsyncpa [#allocation4 + $0x1], 0  ;;  %s862_s18 = smov 0   ;;  %s864_s19 = smov 0  }
   0x4   :  { %s866_s20 = smov 0   ;;  %s868_s21 = smov 0  }
   0x5   :  { %s870_s22 = smov 0   ;;  %s872_s23 = smov 0  }
   0x6 LB: > { %s619_s24 = sadd.s32 4294967295, %s825_s23   ;;  %s620_s25 = sadd.s32 4294967294, %s825_s23   ;;  %s825_s23 = sphi %s872_s23, %s21_s23   ;;  %s821_s22 = sphi %s870_s22, %s1048_s22   ;;  %s817_s21 = sphi %s868_s21, %s1047_s21   ;;  %s813_s20 = sphi %s866_s20, %s1046_s20   ;;  %s809_s19 = sphi %s864_s19, %s1045_s19   ;;  %s805_s18 = sphi %s862_s18, %s1044_s18  }
   0x7   : > { %s33_s26 = sadd.s32 1, %s821_s22  ;;  %s42_s27 = sadd.s32 1, %s813_s20 }
   0x8   : > { %p35_p0 = scmp.ge.s32.totalorder %s33_s26, 2  ;;  %p49_p1 = scmp.ne.s32.totalorder %s813_s20, %s809_s19 }
   0x9   : > { %p50_p2 = scmp.eq.s32.totalorder %s825_s23, 0  ;;  %p55_p3 = scmp.ne.s32.totalorder %s809_s19, %s805_s18 }
   0xa   : > { %s1050_s26 = smov (%p35_p0, %s33_s26), 0  ;;  %p56_p5 = scmp.eq.s32.totalorder %s619_s24, 0 }
   0xb   : > { %p903_p4 = por %p50_p2, %p49_p1  ;;  %s37_s29 = ssub.s32 %s821_s22, %s1050_s26 }
   0xc   : > { %p165_p6 = scmp.eq.s32.totalorder %s619_s24, 1  ;;  %p40_p7 = scmp.eq.s32.totalorder %s37_s29, 0 }
   0xd   : > { %p909_p8 = por %p56_p5, %p55_p3  ;;  %p171_p10 = scmp.eq.s32.totalorder %s620_s25, 1 }
   0xe   : > { %p913_p9 = por %p165_p6, %p49_p1  ;;  %p654_p13 = scmp.lt.s32.totalorder %s825_s23, 2 }
   0xf   : > { %s918_s7 = scalar_select %p40_p7, %s813_s20, %s42_s27  }
  0x10   : > { %p920_p11 = por %p171_p10, %p55_p3  ;;  %s203_s9 = sand.u32 1, %s813_s20  }
  0x11   : > { %s623_s10 = sshll.u32 %s203_s9, 3  ;;  %s640_s11 = sshll.u32 %s821_s22, 7 }
  0x12   : > { %s1040_s8 = scalar_select %p920_p11, 1, 0 }
  0x13   : > { %s215_s14 = scalar_lea.hbm %s1031_s0, %s640_s11  ;;  %s207_s15 = scalar_lea.vmem [#allocation2], %s623_s10 }
  0x14   : > { %s217_s16 = sshll.u32 %s207_s15, 4  ;;  %p933_p0 = pnand %p654_p13, %p903_p4  ;;  %s218_s16 = int_to_ptr.vmem [resolvable:$true] %s217_s16 }
  0x15   : > { %p626_p1 = scmp.ge.s32.totalorder %s825_s23, 1  ;;  %p222_p2 = scmp.lt.s32.totalorder %s825_s23, 3 }
  0x16   : > { %s204_s24 = scalar_lea.sflag [#allocation3], %s203_s9  ;;  %p719_p3 = pneg %p933_p0 }
  0x17   : > { %s730_s25 = scalar_lea.vmem %s218_s16, 128  ;;  %s827_s27 = smov [#allocation2]  }
  0x18   : > { %p731_p5 = scmp.ne.s32.totalorder %s218_s16, %s730_s25  ;;  %s735_s29 = sshll.u32 %s827_s27, 4  ;;  %s736_s29 = int_to_ptr.vmem [resolvable:$false] %s735_s29 }
  0x19   : > { %s737_s10 = scalar_lea.vmem %s736_s29, 256  ;;  %p738_p10 = scmp.lt.s32.totalorder %s218_s16, %s736_s29 }
  0x1a   : > { %p733_p6 = pnand %p731_p5, %p719_p3  ;;  %p739_p12 = scmp.lt.s32.totalorder %s737_s10, %s730_s25 }
  0x1c   : > { %p734_p7 = pneg %p733_p6  ;;  %p740_p4 = por %p739_p12, %p738_p10 }
  0x1e   : > { %p741_p13 = pnand %p740_p4, %p734_p7 }
  0x20   : > { %744 = shalt.err (!%p741_p13)
}
  0x21   : > { %649 = dma.hbm_to_vmem [thread:$0]  (!%p933_p0), %s215_s14, 128, %s218_s16, %s204_s24  }
  0x22   : > { %p223_p11 = pnand %p626_p1, %p222_p2 }
  0x23   : > { %s948_s28 = sand.u32 (!%p223_p11), 1, %s809_s19  }
  0x24   : > { %226 = sbr.rel (%p223_p11) target bundleno = 539 (0x21b), region = 40  ;;  %s627_s9 = sshll.u32 (!%p223_p11), %s948_s28, 3 }
  0x25   : > { %s229_s11 = scalar_lea.sflag (!%p223_p11), [#allocation3], %s948_s28  ;;  %s232_s12 = scalar_lea.vmem (!%p223_p11), [#allocation2], %s627_s9 }
  0x29   : > { %796 = dma.done.wait (%p909_p8), %s229_s11, 128  }
  0x2a   : > { %798 = vsyncadd (%p909_p8), %s229_s11, 4294967168  ;;  %v828_v0 = vmov 0.0   ;;  %v829_v1 = vmov 0   ;;  %v956_v2 = vld [vmem:[%s232_s12] sm:$0xff]  ;;  %vm275_vm0 = vcmask 1043456   ;;  %vm271_vm1 = vcmask 31744  }
  0x2b   : > { %344 = vmatprep.mubr.f32.mxu0 %v828_v0  ;;  %707 = vset.pattern.permute.xlu0 %v829_v1  ;;  %v263_v3 = vld [vmem:[%s1033_s2] sm:$0xf]  ;;  %v963_v4 = vcombine.high %v956_v2, %v956_v2  ;;  %s628_s27 = sshll.u32 %s948_s28, 1  ;;  %s641_s29 = sshll.u32 %s817_s21, 5 }
  0x2c   : > { %433 = vmatprep.mubr.f32.mxu1 %v828_v0  ;;  %266 = vperm.xlu0 %707, %v263_v3   ;;  %v262_v5 = vld [vmem:[%s1032_s1] sm:$0xf]  ;;  %s258_s10 = scalar_lea.vmem [#allocation5], %s628_s27  ;;  %s533_s13 = scalar_lea.hbm %s1036_s5, %s641_s29 }
  0x2d   : > { %v354_v6 = vld [vmem:[%s1035_s4] sm:$0xf]  ;;  %629 = vmatprep.subr.msk.mxu0 %vm275_vm0, %v963_v4  ;;  %s535_s9 = sshll.u32 %s258_s10, 4  ;;  %s519_s14 = scalar_lea.sflag [#allocation4], %s948_s28  ;;  %s536_s9 = int_to_ptr.vmem [resolvable:$true] %s535_s9 }
  0x2e   : > { %630 = vmatpush1.msk.msra.mxu0 %vm275_vm0, %v956_v2  ;;  %v353_v14 = vld [vmem:[%s1034_s3] sm:$0xf]  ;;  %s745_s15 = scalar_lea.vmem %s536_s9, 32  ;;  %s831_s30 = smov [#allocation5]  }
  0x2f   : > { %631 = vmatmul.mubr.msk.f32.vlgmr.msra.gmra.mxu0 %vm271_vm1, %v262_v5  ;;  %v830_v5 = vmov 1966171168   ;;  %p746_p8 = scmp.ne.s32.totalorder %s536_s9, %s745_s15  ;;  %s749_s16 = sshll.u32 %s831_s30, 4  ;;  %s750_s16 = int_to_ptr.vmem [resolvable:$false] %s749_s16 }
  0x30   : > { %357 = vperm.xlu0 %707, %v354_v6   ;;  %v499_v6 = vunpack.c.l.s4 %v830_v5  ;;  %s751_s21 = scalar_lea.vmem %s750_s16, 64  ;;  %p752_p0 = scmp.lt.s32.totalorder %s536_s9, %s750_s16 }
  0x31   : > { %p747_p11 = pnand %p746_p8, %p913_p9  ;;  %p753_p1 = scmp.lt.s32.totalorder %s751_s21, %s745_s15 }
  0x33   : > { %p748_p12 = pneg %p747_p11  ;;  %p754_p2 = por %p753_p1, %p752_p0 }
  0x35   : > { %p755_p3 = pnand %p754_p2, %p748_p12 }
  0xa7   : > { %v267_v8 = vpop.permute.xlu0 %266 }
  0xab   : > { %v358_v15 = vpop.permute.xlu0 %357 }
  0xef   : > { %v346_v7 = vpop.f32.mrf.mxu0 }
  0xf0   : > { %v347_v9 = vadd.f32 %v346_v7, %v267_v8  ;;  %v501_v7 = vlaneseq }
  0xf1   : > { %v348_v10 = vpop.f32.mrf.mxu0 }
  0xf2   : > { %v349_v11 = vadd.f32 %v348_v10, %v267_v8  ;;  %v351_v13 = vmax.f32 %v347_v9, 0.0  ;;  %vm515_vm2 = vcmp.lt.s32.totalorder %v501_v7, 256 }
  0xf4   : > { %v352_v12 = vmax.f32 %v349_v11, 0.0  ;;  %v500_v11 = vunpack.c.0.s8 %v499_v6 }
  0xf6   : > { %632 = vmatprep.subr.msk.mxu1 %vm275_vm0, %v352_v12  ;;  %v502_v12 = vshrl.u32 %v501_v7, 7 }
  0xf7   : > { %633 = vmatpush1.msk.msra.mxu1 %vm275_vm0, %v351_v13 }
  0xf8   : > { %634 = vmatmul.mubr.msk.f32.vlgmr.msra.gmra.mxu1 %vm271_vm1, %v353_v14 }
 0x1b8   : > { %v435_v16 = vpop.f32.mrf.mxu1 }
 0x1b9   : > { %v436_v17 = vadd.f32 %v435_v16, %v358_v15 }
 0x1ba   : > { %v437_v18 = vpop.f32.mrf.mxu1 }
 0x1bb   : > { %v440_v19 = vsel %vm275_vm0, %v436_v17, -inf  ;;  %v438_v20 = vadd.f32 %v437_v18, %v358_v15  ;;  %v503_v15 = vsub.s32 %v500_v11, %v502_v12 }
 0x1bc   : > { %v441_v21 = vrot.slane %v440_v19, 4 }
 0x1bd   : > { %v447_v22 = vsel %vm275_vm0, %v438_v20, -inf }
 0x1be   : > { %v442_v23 = vmax.f32 %v440_v19, %v441_v21  ;;  %v448_v24 = vrot.slane %v447_v22, 4 }
 0x1c0   : > { %v443_v25 = vrot.slane %v442_v23, 2  ;;  %v449_v26 = vmax.f32 %v447_v22, %v448_v24 }
 0x1c2   : > { %v444_v27 = vmax.f32 %v442_v23, %v443_v25  ;;  %v450_v28 = vrot.slane %v449_v26, 2 }
 0x1c4   : > { %v445_v29 = vrot.slane %v444_v27, 1  ;;  %v451_v30 = vmax.f32 %v449_v26, %v450_v28 }
 0x1c6   : > { %v446_v31 = vmax.f32 %v444_v27, %v445_v29  ;;  %v452_v32 = vrot.slane %v451_v30, 1 }
 0x1c8   : > { %v454_v33 = vsub.f32 %v436_v17, %v446_v31  ;;  %v453_v34 = vmax.f32 %v451_v30, %v452_v32 }
 0x1ca   : > { %v456_v35 = vmul.f32 1.442695, %v454_v33  ;;  %v455_v36 = vsub.f32 %v438_v20, %v453_v34 }
 0x1cc   : > { %709 = vpow2.f32 %v456_v35  ;;  %v458_v37 = vmul.f32 1.442695, %v455_v36 }
 0x1ce   : > { %711 = vpow2.f32 %v458_v37 }
 0x1d9   : > { %v710_v38 = vpop.eup %709 }
 0x1da   : > { %v460_v39 = vsel %vm275_vm0, %v710_v38, 0.0 }
 0x1db   : > { %v712_v40 = vpop.eup %711  ;;  %v461_v41 = vrot.slane %v460_v39, 4 }
 0x1dc   : > { %v467_v42 = vsel %vm275_vm0, %v712_v40, 0.0 }
 0x1dd   : > { %v462_v43 = vadd.f32 %v461_v41, %v460_v39  ;;  %v468_v44 = vrot.slane %v467_v42, 4 }
 0x1df   : > { %v463_v45 = vrot.slane %v462_v43, 2  ;;  %v469_v46 = vadd.f32 %v468_v44, %v467_v42 }
 0x1e1   : > { %v464_v47 = vadd.f32 %v463_v45, %v462_v43  ;;  %v470_v48 = vrot.slane %v469_v46, 2 }
 0x1e3   : > { %v465_v49 = vrot.slane %v464_v47, 1  ;;  %v471_v50 = vadd.f32 %v470_v48, %v469_v46 }
 0x1e5   : > { %v466_v51 = vadd.f32 %v465_v49, %v464_v47  ;;  %v472_v52 = vrot.slane %v471_v50, 1 }
 0x1e7   : > { %713 = vrcp.f32 %v466_v51  ;;  %v473_v53 = vadd.f32 %v472_v52, %v471_v50 }
 0x1e9   : > { %715 = vrcp.f32 %v473_v53 }
 0x1f4   : > { %v714_v54 = vpop.eup %713 }
 0x1f5   : > { %v476_v55 = vmul.f32 %v714_v54, %v710_v38 }
 0x1f6   : > { %v716_v56 = vpop.eup %715 }
 0x1f7   : > { %v479_v57 = vmul.f32 %v476_v55, %v956_v2  ;;  %v477_v58 = vmul.f32 %v716_v56, %v712_v40 }
 0x1f9   : > { %v481_v59 = vsel %vm275_vm0, %v479_v57, 0.0  ;;  %v480_v60 = vmul.f32 %v477_v58, %v963_v4 }
 0x1fa   : > { %v482_v61 = vrot.slane %v481_v59, 4 }
 0x1fb   : > { %v488_v62 = vsel %vm275_vm0, %v480_v60, 0.0 }
 0x1fc   : > { %v483_v63 = vadd.f32 %v482_v61, %v481_v59  ;;  %v489_v0 = vrot.slane %v488_v62, 4 }
 0x1fe   : > { %v490_v1 = vadd.f32 %v489_v0, %v488_v62  ;;  %v484_v3 = vrot.slane %v483_v63, 2 }
 0x200   : > { %v485_v8 = vadd.f32 %v484_v3, %v483_v63  ;;  %v491_v9 = vrot.slane %v490_v1, 2 }
 0x202   : > { %v486_v2 = vrot.slane %v485_v8, 1  ;;  %v492_v10 = vadd.f32 %v491_v9, %v490_v1 }
 0x204   : > { %v493_v4 = vrot.slane %v492_v10, 1  ;;  %v487_v13 = vadd.f32 %v486_v2, %v485_v8 }
 0x206   : > { %v494_v14 = vadd.f32 %v493_v4, %v492_v10 }
 0x208   : > { %v497_v16 = vcombine.low %v487_v13, %v494_v14 }
 0x20a   : > { %v504_v17 = vrot.slane %v497_v16, %v503_v15 }
 0x20c   : > { %v511_v18 = vrot.slane %v504_v17, %v503_v15 }
 0x20e   : > { %517 = vst.msk [vmem:[%s258_s10] sm:$0x3] %vm515_vm2, %v511_v18 }
 0x20f   : > { %758 = shalt.err (!%p755_p3)
}
 0x210   : > { %s759_s17 = scalar_lea.hbm %s533_s13, 32  ;;  %s763_s25 = scalar_lea.hbm %s1036_s5, 64 }
 0x211   : > { %p760_p5 = scmp.ne.s32.totalorder %s533_s13, %s759_s17  ;;  %p764_p10 = scmp.lt.s32.totalorder %s533_s13, %s1036_s5 }
 0x212   : > { %p765_p4 = scmp.lt.s32.totalorder %s763_s25, %s759_s17 }
 0x213   : > { %p761_p6 = pnand %p760_p5, %p913_p9 }
 0x214   : > { %p766_p13 = por %p765_p4, %p764_p10 }
 0x215   : > { %p762_p7 = pneg %p761_p6 }
 0x217   : > { %p767_p8 = pnand %p766_p13, %p762_p7 }
 0x219   : > { %770 = shalt.err (!%p767_p8)
}
 0x21a   : > { %644 = dma.vmem_to_hbm [thread:$0]  (%p913_p9), %s536_s9, 32, %s533_s13, %s519_s14  }
 0x21b PF: > { %s547_s10 = sand.u32 1, %s805_s18   ;;  %p1042_p11 = scmp.ne.s32.totalorder %s1040_s8, 0 }
 0x21c   : > { %p1043_p12 = scmp.ge.s32.totalorder %s825_s23, 2  ;;  %s548_s11 = scalar_lea.sflag [#allocation4], %s547_s10 }
 0x21e   : > { %p651_p0 = pnand %p1043_p12, %p1042_p11 }
 0x220   : > { %p652_p1 = pneg %p651_p0 }
 0x222   : > { %800 = dma.done.wait (%p652_p1), %s548_s11, 32  }
 0x223   : > { %802 = vsyncadd (%p652_p1), %s548_s11, 4294967264  ;;  %s21_s23 = sadd.s32 1, %s825_s23   ;;  %s1044_s18 = smov %s809_s19 }
 0x224   : > { %p18_p2 = scmp.ge.s32.totalorder %s21_s23, 4   ;;  %s1045_s19 = smov %s813_s20 }
 0x225   : > { %s1046_s20 = smov %s918_s7  ;;  %s1047_s21 = smov %s821_s22 }
 0x226   : > { %s1048_s22 = smov %s1050_s26  ;;  %20 = sbr.rel (!%p18_p2) target bundleno = 6 (0x6), region = 85 }
 0x22b   :  { %553 = vsyncpa [#allocation3], 1 }
 0x22c   :  { %555 = vsyncpa [#allocation3 + $0x1], 1 }
 0x22d   :  { %556 = vsyncpa [#allocation4], 1 }
 0x22e   :  { %558 = vsyncpa [#allocation4 + $0x1], 1 }

</bundles_post_ra>
